<compile_context>
chip_gen: v7x
topology: tpu7x:2x2x1
jax: 0.10.0
libtpu: 0.0.40
codegen_flags: <defaults>
</compile_context>

<pallas_src>
import functools

import jax
import jax.numpy as jnp
from jax.experimental import pallas as pl
from jax.experimental.pallas import tpu as pltpu

# ----------------------------- problem sizes -------------------------------
B = 2            # batch
S = 8            # sequence length
D = 32           # hidden size
NUM_HEADS = 4
HEAD_DIM = D // NUM_HEADS
DP = 128         # hidden size padded to one full lane register (lane-dense IO)


# ----------------------------- Pallas kernel -------------------------------
def _t5_attention_kernel(x_ref, bias_ref, wqkv_ref, wo_ref, out_ref):
    """One grid step == one batch element.

    Block shapes (batch dim squeezed away by the BlockSpecs):
      x_ref    : (S, DP)          f32, tokens of this batch, hidden padded to 128
      bias_ref : (NH, S, S)       f32, position_bias + additive key mask
      wqkv_ref : (DP, DP)         bf16, cols [0:3D] = [Wq | Wk | Wv], rest zero
      wo_ref   : (D, DP)          bf16, cols [0:D]  = Wo, rest zero
      out_ref  : (S, DP)          f32, lane-dense (128-wide) output slab
    """
    x32 = x_ref[...]                                            # (S, DP) f32
    xb = x32.astype(jnp.bfloat16)                               # cast only for MXU

    # Fused Q/K/V projection: single full-128-lane MXU pass, f32 accumulation.
    qkv = jnp.dot(xb, wqkv_ref[...],
                  preferred_element_type=jnp.float32)           # (S, DP) f32

    bias = bias_ref[...]                                        # (NH, S, S) f32

    # Per-head views are formed just-in-time as static 2-D lane slices of the
    # packed qkv slab (no lane-sparse 3-D residents, no in-kernel transposes).
    # NH=4 -> static unrolled loop.
    ctx_heads = []
    for h in range(NUM_HEADS):
        lo = h * HEAD_DIM
        q_h = qkv[:, lo:lo + HEAD_DIM].astype(jnp.bfloat16)             # (S, hd)
        k_h = qkv[:, D + lo:D + lo + HEAD_DIM].astype(jnp.bfloat16)     # (S, hd)
        v_h = qkv[:, 2 * D + lo:2 * D + lo + HEAD_DIM].astype(jnp.bfloat16)

        # Scores: contract last dims directly (no explicit transpose op).
        s = jnp.einsum('qe,ke->qk', q_h, k_h,
                       preferred_element_type=jnp.float32)              # (S, S) f32
        s = s + bias[h]

        # Numerically stable softmax along keys, f32 throughout.
        s = s - jnp.max(s, axis=-1, keepdims=True)
        p = jnp.exp(s)
        denom = jnp.sum(p, axis=-1, keepdims=True)
        p = p * pl.reciprocal(denom, approx=True)                       # EUP slot

        ctx_heads.append(
            jnp.dot(p.astype(jnp.bfloat16), v_h,
                    preferred_element_type=jnp.float32))                # (S, hd) f32

    # Re-pack heads into one lane-dense (S, D) slab; one MXU pass for Wo.
    ctx = jnp.concatenate(ctx_heads, axis=-1).astype(jnp.bfloat16)      # (S, D)
    att = jnp.dot(ctx, wo_ref[...],
                  preferred_element_type=jnp.float32)                   # (S, DP) f32

    # Residual with the ORIGINAL f32 activations; unmasked 128-lane store.
    out_ref[...] = x32 + att


# --------------------- one-time parameter preparation -----------------------
def prepare_params(wq, wk, wv, wo):
    """Fuse / pad weights once, outside the (rematerialized) call path."""
    wqkv = jnp.concatenate([wq, wk, wv], axis=1).astype(jnp.float32)     # (D, 3D)
    wqkv_p = (jnp.zeros((DP, DP), jnp.float32)
              .at[:D, :3 * D].set(wqkv)
              .astype(jnp.bfloat16))                                     # (128, 128)
    wo_p = (jnp.zeros((D, DP), jnp.float32)
            .at[:, :D].set(wo.astype(jnp.float32))
            .astype(jnp.bfloat16))                                       # (32, 128)
    return wqkv_p, wo_p


# ------------------------------ module wrapper ------------------------------
def t5_attention_block(hidden_states, attention_mask, position_bias, *,
                       wqkv_p, wo_p):
    """Pallas-backed self-attention block: returns (new_hidden_states, position_bias).

    Only activation-dependent layout plumbing lives here (x padding, folding
    the additive mask into the per-batch bias); weights arrive pre-fused.
    This function is jitted by the caller so the plumbing + kernel compile
    into a single XLA program.
    """
    B_, S_, D_ = hidden_states.shape

    # activations: (B, S, D) -> (B, S, DP), zero-padded, kept f32 (residual path)
    x_pad = jnp.zeros((B_, S_, DP), jnp.float32).at[:, :, :D_].set(
        hidden_states.astype(jnp.float32))

    # fold the additive key mask into the (tiny) per-batch position bias, f32
    bias = (position_bias.astype(jnp.float32)
            + jnp.broadcast_to(attention_mask.astype(jnp.float32),
                               (B_, NUM_HEADS, S_, S_)))

    cost = pl.CostEstimate(
        flops=B_ * (2 * S_ * DP * DP                      # fused QKV projection
                    + 2 * 2 * NUM_HEADS * S_ * S_ * HEAD_DIM   # scores + ctx
                    + 2 * S_ * D_ * DP),                  # output projection
        transcendentals=B_ * NUM_HEADS * S_ * S_ + B_ * NUM_HEADS * S_,
        bytes_accessed=(4 * x_pad.size + 4 * bias.size
                        + 2 * wqkv_p.size + 2 * wo_p.size
                        + 4 * B_ * S_ * DP))

    out_pad = pl.pallas_call(
        _t5_attention_kernel,
        out_shape=jax.ShapeDtypeStruct((B_, S_, DP), jnp.float32),
        grid=(B_,),
        in_specs=[
            pl.BlockSpec((None, S_, DP), lambda b: (b, 0, 0)),
            pl.BlockSpec((None, NUM_HEADS, S_, S_), lambda b: (b, 0, 0, 0)),
            pl.BlockSpec((DP, DP), lambda b: (0, 0)),
            pl.BlockSpec((D_, DP), lambda b: (0, 0)),
        ],
        out_specs=pl.BlockSpec((None, S_, DP), lambda b: (b, 0, 0)),
        compiler_params=pltpu.CompilerParams(
            dimension_semantics=("parallel",)),
        cost_estimate=cost,
    )(x_pad, bias, wqkv_p, wo_p)

    out = out_pad[:, :, :D_].astype(hidden_states.dtype)
    return (out, position_bias)


# ------------------------- pure-JAX reference -------------------------------
def t5_attention_ref(hidden_states, attention_mask, position_bias, wq, wk, wv, wo):
    x = hidden_states.astype(jnp.float32)
    B_, S_, D_ = x.shape

    def split_heads(t):
        return t.reshape(B_, S_, NUM_HEADS, HEAD_DIM).transpose(0, 2, 1, 3)

    q = split_heads(x @ wq)
    k = split_heads(x @ wk)
    v = split_heads(x @ wv)
    scores = jnp.einsum('bhqe,bhke->bhqk', q, k) + position_bias + attention_mask
    p = jax.nn.softmax(scores, axis=-1)
    ctx = jnp.einsum('bhqk,bhke->bhqe', p, v)
    ctx = ctx.transpose(0, 2, 1, 3).reshape(B_, S_, D_)
    return x + ctx @ wo


# --------------------------- CheckpointWrapper ------------------------------
class CheckpointWrapper:
    """JAX analogue of the PyTorch CheckpointWrapper.

    Replaces None outputs by empty arrays so that jax.checkpoint (remat) can be
    applied to the wrapped module.
    """

    def __init__(self, module, use_checkpoint=False):
        self.module = module
        self.use_checkpoint = use_checkpoint
        self.training = False

    def __call__(self, hidden_states, attention_mask, position_bias, **kwargs):
        if self.use_checkpoint and self.training:
            kwargs = {k: v for k, v in kwargs.items() if v is not None}

            def custom_forward(*inputs):
                output = self.module(*inputs, **kwargs)
                empty = jnp.zeros((0,), dtype=jnp.float32)
                return tuple(x if x is not None else empty for x in output)

            # jax.checkpoint == torch.utils.checkpoint.checkpoint (remat)
            output = jax.checkpoint(custom_forward)(
                hidden_states, attention_mask, position_bias)
            output = tuple(x if x.size != 0 else None for x in output)
        else:
            output = self.module(hidden_states, attention_mask, position_bias, **kwargs)
        return output


# --------------------------------- main -------------------------------------
if __name__ == "__main__":
    key = jax.random.PRNGKey(0)
    k_x, k_b, k_q, k_k, k_v, k_o = jax.random.split(key, 6)

    # deterministic inputs / parameters
    hidden_states = jax.random.normal(k_x, (B, S, D), dtype=jnp.float32)

    # additive attention mask: mask out the last 2 key positions of batch 1
    mask = jnp.zeros((B, 1, 1, S), dtype=jnp.float32)
    mask = mask.at[1, 0, 0, S - 2:].set(-1e9)

    position_bias = 0.1 * jax.random.normal(
        k_b, (B, NUM_HEADS, S, S), dtype=jnp.float32)

    scale = 1.0 / jnp.sqrt(jnp.float32(D))
    wq = scale * jax.random.normal(k_q, (D, D), dtype=jnp.float32)
    wk = scale * jax.random.normal(k_k, (D, D), dtype=jnp.float32)
    wv = scale * jax.random.normal(k_v, (D, D), dtype=jnp.float32)
    wo = scale * jax.random.normal(k_o, (D, D), dtype=jnp.float32)

    # one-time weight fusion / padding -- hoisted out of the call (and remat) path
    wqkv_p, wo_p = prepare_params(wq, wk, wv, wo)
    jax.block_until_ready(wqkv_p)

    module_fn = jax.jit(functools.partial(
        t5_attention_block, wqkv_p=wqkv_p, wo_p=wo_p))

    # eval path (use_checkpoint False / not training) -- plain forward
    wrapper = CheckpointWrapper(module_fn, use_checkpoint=False)
    out_eval = wrapper(hidden_states, mask, position_bias)
    jax.block_until_ready(out_eval[0])

    # checkpointed training path (forward; remat wraps the Pallas kernel)
    # TODO(synk): backward through pallas_call would need a custom VJP (flash-style
    # backward kernel); only the forward/remat semantics of the wrapper are exercised.
    wrapper_ckpt = CheckpointWrapper(module_fn, use_checkpoint=True)
    wrapper_ckpt.training = True
    out_ckpt = wrapper_ckpt(hidden_states, mask, position_bias)
    jax.block_until_ready(out_ckpt[0])

    # correctness vs. pure-JAX f32 reference (kernel uses bf16 MXU inputs)
    ref = t5_attention_ref(hidden_states, mask, position_bias, wq, wk, wv, wo)

    assert out_eval[0].shape == (B, S, D)
    assert out_ckpt[0].shape == (B, S, D)
    assert jnp.allclose(out_eval[0], out_ckpt[0], atol=1e-5)
    assert jnp.allclose(out_eval[0], ref, atol=5e-2, rtol=5e-2)

    print("KERNEL_OK")
</pallas_src>

<mosaic_0001>
module attributes {stable_mosaic.version = 11 : i64} {
  func.func @_t5_attention_kernel(%arg0: i32, %arg1: memref<1x8x128xf32, #tpu.memory_space<vmem>>, %arg2: memref<1x4x8x8xf32, #tpu.memory_space<vmem>>, %arg3: memref<128x128xbf16, #tpu.memory_space<vmem>>, %arg4: memref<32x128xbf16, #tpu.memory_space<vmem>>, %arg5: memref<1x8x128xf32, #tpu.memory_space<vmem>>) attributes {dimension_semantics = [#tpu.dimension_semantics<parallel>], iteration_bounds = array<i64: 2>, scalar_prefetch = 0 : i64, scratch_operands = 0 : i64, tpu.core_type = #tpu.core_type<tc>, window_params = [{transform_indices = @transform_0, window_bounds = array<i64: 1, 8, 128>}, {transform_indices = @transform_1, window_bounds = array<i64: 1, 4, 8, 8>}, {pipeline_mode = #tpu.pipeline_mode<synchronous>, transform_indices = @transform_2, window_bounds = array<i64: 128, 128>}, {pipeline_mode = #tpu.pipeline_mode<synchronous>, transform_indices = @transform_3, window_bounds = array<i64: 32, 128>}, {transform_indices = @transform_4, window_bounds = array<i64: 1, 8, 128>}]} {
    %c0 = arith.constant 0 : index
    %c0_0 = arith.constant 0 : index
    %c0_1 = arith.constant 0 : index
    %0 = vector.load %arg1[%c0, %c0_0, %c0_1] : memref<1x8x128xf32, #tpu.memory_space<vmem>>, vector<1x8x128xf32>
    %1 = vector.shape_cast %0 : vector<1x8x128xf32> to vector<8x128xf32>
    %2 = arith.truncf %1 : vector<8x128xf32> to vector<8x128xbf16>
    %c0_2 = arith.constant 0 : index
    %c0_3 = arith.constant 0 : index
    %3 = vector.load %arg3[%c0_2, %c0_3] : memref<128x128xbf16, #tpu.memory_space<vmem>>, vector<128x128xbf16>
    %cst = arith.constant dense<0.000000e+00> : vector<8x128xf32>
    %4 = tpu.matmul %2, %3, %cst {dimension_numbers = #tpu.dot_dimension_numbers<[1], [0], [0], [1], [0, 0, 1, 1], [], []>} : vector<8x128xbf16>, vector<128x128xbf16>, vector<8x128xf32> -> vector<8x128xf32>
    %c0_4 = arith.constant 0 : index
    %c0_5 = arith.constant 0 : index
    %c0_6 = arith.constant 0 : index
    %c0_7 = arith.constant 0 : index
    %5 = vector.load %arg2[%c0_4, %c0_5, %c0_6, %c0_7] : memref<1x4x8x8xf32, #tpu.memory_space<vmem>>, vector<1x4x8x8xf32>
    %6 = vector.shape_cast %5 : vector<1x4x8x8xf32> to vector<4x8x8xf32>
    %7 = vector.extract_strided_slice %4 {offsets = [0, 0], sizes = [8, 8], strides = [1, 1]} : vector<8x128xf32> to vector<8x8xf32>
    %8 = arith.truncf %7 : vector<8x8xf32> to vector<8x8xbf16>
    %9 = vector.extract_strided_slice %4 {offsets = [0, 32], sizes = [8, 8], strides = [1, 1]} : vector<8x128xf32> to vector<8x8xf32>
    %10 = arith.truncf %9 : vector<8x8xf32> to vector<8x8xbf16>
    %11 = vector.extract_strided_slice %4 {offsets = [0, 64], sizes = [8, 8], strides = [1, 1]} : vector<8x128xf32> to vector<8x8xf32>
    %12 = arith.truncf %11 : vector<8x8xf32> to vector<8x8xbf16>
    "tpu.trace_start"() <{level = 10 : i32, message = "qe,ke->qk"}> : () -> ()
    %cst_8 = arith.constant dense<0.000000e+00> : vector<8x8xf32>
    %13 = tpu.matmul %8, %10, %cst_8 {dimension_numbers = #tpu.dot_dimension_numbers<[1], [1], [0], [0], [0, 0, 1, 0], [], []>} : vector<8x8xbf16>, vector<8x8xbf16>, vector<8x8xf32> -> vector<8x8xf32>
    "tpu.trace_stop"() : () -> ()
    %14 = vector.extract_strided_slice %6 {offsets = [0, 0, 0], sizes = [1, 8, 8], strides = [1, 1, 1]} : vector<4x8x8xf32> to vector<1x8x8xf32>
    %15 = vector.shape_cast %14 : vector<1x8x8xf32> to vector<8x8xf32>
    %16 = arith.addf %13, %15 : vector<8x8xf32>
    %cst_9 = arith.constant dense<0xFF800000> : vector<8xf32>
    %17 = vector.multi_reduction <maximumf>, %16, %cst_9 [1] : vector<8x8xf32> to vector<8xf32>
    %18 = vector.shape_cast %17 : vector<8xf32> to vector<8x1xf32>
    %19 = vector.broadcast %18 : vector<8x1xf32> to vector<8x8xf32>
    %20 = arith.subf %16, %19 : vector<8x8xf32>
    %21 = math.exp %20 : vector<8x8xf32>
    %cst_10 = arith.constant dense<0.000000e+00> : vector<8xf32>
    %22 = vector.multi_reduction <add>, %21, %cst_10 [1] : vector<8x8xf32> to vector<8xf32>
    %23 = vector.shape_cast %22 : vector<8xf32> to vector<8x1xf32>
    %24 = tpu.reciprocal %23 {approx = true} : vector<8x1xf32> -> vector<8x1xf32>
    %25 = vector.broadcast %24 : vector<8x1xf32> to vector<8x8xf32>
    %26 = arith.mulf %21, %25 : vector<8x8xf32>
    %27 = arith.truncf %26 : vector<8x8xf32> to vector<8x8xbf16>
    %cst_11 = arith.constant dense<0.000000e+00> : vector<8x8xf32>
    %28 = tpu.matmul %27, %12, %cst_11 {dimension_numbers = #tpu.dot_dimension_numbers<[1], [0], [0], [1], [0, 0, 1, 1], [], []>} : vector<8x8xbf16>, vector<8x8xbf16>, vector<8x8xf32> -> vector<8x8xf32>
    %29 = vector.extract_strided_slice %4 {offsets = [0, 8], sizes = [8, 8], strides = [1, 1]} : vector<8x128xf32> to vector<8x8xf32>
    %30 = arith.truncf %29 : vector<8x8xf32> to vector<8x8xbf16>
    %31 = vector.extract_strided_slice %4 {offsets = [0, 40], sizes = [8, 8], strides = [1, 1]} : vector<8x128xf32> to vector<8x8xf32>
    %32 = arith.truncf %31 : vector<8x8xf32> to vector<8x8xbf16>
    %33 = vector.extract_strided_slice %4 {offsets = [0, 72], sizes = [8, 8], strides = [1, 1]} : vector<8x128xf32> to vector<8x8xf32>
    %34 = arith.truncf %33 : vector<8x8xf32> to vector<8x8xbf16>
    "tpu.trace_start"() <{level = 10 : i32, message = "qe,ke->qk"}> : () -> ()
    %cst_12 = arith.constant dense<0.000000e+00> : vector<8x8xf32>
    %35 = tpu.matmul %30, %32, %cst_12 {dimension_numbers = #tpu.dot_dimension_numbers<[1], [1], [0], [0], [0, 0, 1, 0], [], []>} : vector<8x8xbf16>, vector<8x8xbf16>, vector<8x8xf32> -> vector<8x8xf32>
    "tpu.trace_stop"() : () -> ()
    %36 = vector.extract_strided_slice %6 {offsets = [1, 0, 0], sizes = [1, 8, 8], strides = [1, 1, 1]} : vector<4x8x8xf32> to vector<1x8x8xf32>
    %37 = vector.shape_cast %36 : vector<1x8x8xf32> to vector<8x8xf32>
    %38 = arith.addf %35, %37 : vector<8x8xf32>
    %cst_13 = arith.constant dense<0xFF800000> : vector<8xf32>
    %39 = vector.multi_reduction <maximumf>, %38, %cst_13 [1] : vector<8x8xf32> to vector<8xf32>
    %40 = vector.shape_cast %39 : vector<8xf32> to vector<8x1xf32>
    %41 = vector.broadcast %40 : vector<8x1xf32> to vector<8x8xf32>
    %42 = arith.subf %38, %41 : vector<8x8xf32>
    %43 = math.exp %42 : vector<8x8xf32>
    %cst_14 = arith.constant dense<0.000000e+00> : vector<8xf32>
    %44 = vector.multi_reduction <add>, %43, %cst_14 [1] : vector<8x8xf32> to vector<8xf32>
    %45 = vector.shape_cast %44 : vector<8xf32> to vector<8x1xf32>
    %46 = tpu.reciprocal %45 {approx = true} : vector<8x1xf32> -> vector<8x1xf32>
    %47 = vector.broadcast %46 : vector<8x1xf32> to vector<8x8xf32>
    %48 = arith.mulf %43, %47 : vector<8x8xf32>
    %49 = arith.truncf %48 : vector<8x8xf32> to vector<8x8xbf16>
    %cst_15 = arith.constant dense<0.000000e+00> : vector<8x8xf32>
    %50 = tpu.matmul %49, %34, %cst_15 {dimension_numbers = #tpu.dot_dimension_numbers<[1], [0], [0], [1], [0, 0, 1, 1], [], []>} : vector<8x8xbf16>, vector<8x8xbf16>, vector<8x8xf32> -> vector<8x8xf32>
    %51 = vector.extract_strided_slice %4 {offsets = [0, 16], sizes = [8, 8], strides = [1, 1]} : vector<8x128xf32> to vector<8x8xf32>
    %52 = arith.truncf %51 : vector<8x8xf32> to vector<8x8xbf16>
    %53 = vector.extract_strided_slice %4 {offsets = [0, 48], sizes = [8, 8], strides = [1, 1]} : vector<8x128xf32> to vector<8x8xf32>
    %54 = arith.truncf %53 : vector<8x8xf32> to vector<8x8xbf16>
    %55 = vector.extract_strided_slice %4 {offsets = [0, 80], sizes = [8, 8], strides = [1, 1]} : vector<8x128xf32> to vector<8x8xf32>
    %56 = arith.truncf %55 : vector<8x8xf32> to vector<8x8xbf16>
    "tpu.trace_start"() <{level = 10 : i32, message = "qe,ke->qk"}> : () -> ()
    %cst_16 = arith.constant dense<0.000000e+00> : vector<8x8xf32>
    %57 = tpu.matmul %52, %54, %cst_16 {dimension_numbers = #tpu.dot_dimension_numbers<[1], [1], [0], [0], [0, 0, 1, 0], [], []>} : vector<8x8xbf16>, vector<8x8xbf16>, vector<8x8xf32> -> vector<8x8xf32>
    "tpu.trace_stop"() : () -> ()
    %58 = vector.extract_strided_slice %6 {offsets = [2, 0, 0], sizes = [1, 8, 8], strides = [1, 1, 1]} : vector<4x8x8xf32> to vector<1x8x8xf32>
    %59 = vector.shape_cast %58 : vector<1x8x8xf32> to vector<8x8xf32>
    %60 = arith.addf %57, %59 : vector<8x8xf32>
    %cst_17 = arith.constant dense<0xFF800000> : vector<8xf32>
    %61 = vector.multi_reduction <maximumf>, %60, %cst_17 [1] : vector<8x8xf32> to vector<8xf32>
    %62 = vector.shape_cast %61 : vector<8xf32> to vector<8x1xf32>
    %63 = vector.broadcast %62 : vector<8x1xf32> to vector<8x8xf32>
    %64 = arith.subf %60, %63 : vector<8x8xf32>
    %65 = math.exp %64 : vector<8x8xf32>
    %cst_18 = arith.constant dense<0.000000e+00> : vector<8xf32>
    %66 = vector.multi_reduction <add>, %65, %cst_18 [1] : vector<8x8xf32> to vector<8xf32>
    %67 = vector.shape_cast %66 : vector<8xf32> to vector<8x1xf32>
    %68 = tpu.reciprocal %67 {approx = true} : vector<8x1xf32> -> vector<8x1xf32>
    %69 = vector.broadcast %68 : vector<8x1xf32> to vector<8x8xf32>
    %70 = arith.mulf %65, %69 : vector<8x8xf32>
    %71 = arith.truncf %70 : vector<8x8xf32> to vector<8x8xbf16>
    %cst_19 = arith.constant dense<0.000000e+00> : vector<8x8xf32>
    %72 = tpu.matmul %71, %56, %cst_19 {dimension_numbers = #tpu.dot_dimension_numbers<[1], [0], [0], [1], [0, 0, 1, 1], [], []>} : vector<8x8xbf16>, vector<8x8xbf16>, vector<8x8xf32> -> vector<8x8xf32>
    %73 = vector.extract_strided_slice %4 {offsets = [0, 24], sizes = [8, 8], strides = [1, 1]} : vector<8x128xf32> to vector<8x8xf32>
    %74 = arith.truncf %73 : vector<8x8xf32> to vector<8x8xbf16>
    %75 = vector.extract_strided_slice %4 {offsets = [0, 56], sizes = [8, 8], strides = [1, 1]} : vector<8x128xf32> to vector<8x8xf32>
    %76 = arith.truncf %75 : vector<8x8xf32> to vector<8x8xbf16>
    %77 = vector.extract_strided_slice %4 {offsets = [0, 88], sizes = [8, 8], strides = [1, 1]} : vector<8x128xf32> to vector<8x8xf32>
    %78 = arith.truncf %77 : vector<8x8xf32> to vector<8x8xbf16>
    "tpu.trace_start"() <{level = 10 : i32, message = "qe,ke->qk"}> : () -> ()
    %cst_20 = arith.constant dense<0.000000e+00> : vector<8x8xf32>
    %79 = tpu.matmul %74, %76, %cst_20 {dimension_numbers = #tpu.dot_dimension_numbers<[1], [1], [0], [0], [0, 0, 1, 0], [], []>} : vector<8x8xbf16>, vector<8x8xbf16>, vector<8x8xf32> -> vector<8x8xf32>
    "tpu.trace_stop"() : () -> ()
    %80 = vector.extract_strided_slice %6 {offsets = [3, 0, 0], sizes = [1, 8, 8], strides = [1, 1, 1]} : vector<4x8x8xf32> to vector<1x8x8xf32>
    %81 = vector.shape_cast %80 : vector<1x8x8xf32> to vector<8x8xf32>
    %82 = arith.addf %79, %81 : vector<8x8xf32>
    %cst_21 = arith.constant dense<0xFF800000> : vector<8xf32>
    %83 = vector.multi_reduction <maximumf>, %82, %cst_21 [1] : vector<8x8xf32> to vector<8xf32>
    %84 = vector.shape_cast %83 : vector<8xf32> to vector<8x1xf32>
    %85 = vector.broadcast %84 : vector<8x1xf32> to vector<8x8xf32>
    %86 = arith.subf %82, %85 : vector<8x8xf32>
    %87 = math.exp %86 : vector<8x8xf32>
    %cst_22 = arith.constant dense<0.000000e+00> : vector<8xf32>
    %88 = vector.multi_reduction <add>, %87, %cst_22 [1] : vector<8x8xf32> to vector<8xf32>
    %89 = vector.shape_cast %88 : vector<8xf32> to vector<8x1xf32>
    %90 = tpu.reciprocal %89 {approx = true} : vector<8x1xf32> -> vector<8x1xf32>
    %91 = vector.broadcast %90 : vector<8x1xf32> to vector<8x8xf32>
    %92 = arith.mulf %87, %91 : vector<8x8xf32>
    %93 = arith.truncf %92 : vector<8x8xf32> to vector<8x8xbf16>
    %cst_23 = arith.constant dense<0.000000e+00> : vector<8x8xf32>
    %94 = tpu.matmul %93, %78, %cst_23 {dimension_numbers = #tpu.dot_dimension_numbers<[1], [0], [0], [1], [0, 0, 1, 1], [], []>} : vector<8x8xbf16>, vector<8x8xbf16>, vector<8x8xf32> -> vector<8x8xf32>
    %95 = tpu.concatenate %28, %50, %72, %94 in 1 : vector<8x8xf32>, vector<8x8xf32>, vector<8x8xf32>, vector<8x8xf32> -> vector<8x32xf32>
    %96 = arith.truncf %95 : vector<8x32xf32> to vector<8x32xbf16>
    %c0_24 = arith.constant 0 : index
    %c0_25 = arith.constant 0 : index
    %97 = vector.load %arg4[%c0_24, %c0_25] : memref<32x128xbf16, #tpu.memory_space<vmem>>, vector<32x128xbf16>
    %cst_26 = arith.constant dense<0.000000e+00> : vector<8x128xf32>
    %98 = tpu.matmul %96, %97, %cst_26 {dimension_numbers = #tpu.dot_dimension_numbers<[1], [0], [0], [1], [0, 0, 1, 1], [], []>} : vector<8x32xbf16>, vector<32x128xbf16>, vector<8x128xf32> -> vector<8x128xf32>
    %99 = arith.addf %1, %98 : vector<8x128xf32>
    %c0_27 = arith.constant 0 : index
    %c0_28 = arith.constant 0 : index
    %c0_29 = arith.constant 0 : index
    %100 = vector.load %arg5[%c0_27, %c0_28, %c0_29] : memref<1x8x128xf32, #tpu.memory_space<vmem>>, vector<1x8x128xf32>
    %101 = vector.shape_cast %100 : vector<1x8x128xf32> to vector<8x128xf32>
    %102 = vector.shape_cast %99 : vector<8x128xf32> to vector<1x8x128xf32>
    tpu.vector_store %arg5[%c0_27, %c0_28, %c0_29], %102 {strides = array<i32>} : memref<1x8x128xf32, #tpu.memory_space<vmem>>, vector<1x8x128xf32>,
    return
  }
  func.func @transform_0(%arg0: i32) -> (i32, i32, i32) {
    %c0_i32 = arith.constant 0 : i32
    %c0_i32_0 = arith.constant 0 : i32
    %c0_i32_1 = arith.constant 0 : i32
    return %arg0, %c0_i32, %c0_i32_0 : i32, i32, i32
  }
  func.func @transform_1(%arg0: i32) -> (i32, i32, i32, i32) {
    %c0_i32 = arith.constant 0 : i32
    %c0_i32_0 = arith.constant 0 : i32
    %c0_i32_1 = arith.constant 0 : i32
    %c0_i32_2 = arith.constant 0 : i32
    return %arg0, %c0_i32, %c0_i32_0, %c0_i32_1 : i32, i32, i32, i32
  }
  func.func @transform_2(%arg0: i32) -> (i32, i32) {
    %c0_i32 = arith.constant 0 : i32
    %c0_i32_0 = arith.constant 0 : i32
    %c0_i32_1 = arith.constant 0 : i32
    return %c0_i32, %c0_i32_0 : i32, i32
  }
  func.func @transform_3(%arg0: i32) -> (i32, i32) {
    %c0_i32 = arith.constant 0 : i32
    %c0_i32_0 = arith.constant 0 : i32
    %c0_i32_1 = arith.constant 0 : i32
    return %c0_i32, %c0_i32_0 : i32, i32
  }
  func.func @transform_4(%arg0: i32) -> (i32, i32, i32) {
    %c0_i32 = arith.constant 0 : i32
    %c0_i32_0 = arith.constant 0 : i32
    %c0_i32_1 = arith.constant 0 : i32
    return %arg0, %c0_i32, %c0_i32_0 : i32, i32, i32
  }
}

</mosaic_0001>

<bundles_post_ra>
// kernel: t5_attention_block.1
= control target key start
LH: loop header
LB: loop body
LE: loop exit
PB: predicated region body
PF: predicated region fallthrough
CT: control target
= control target key end

     0   :  { %9 = vsyncpa [#allocation3], 0  ;;  %s1482_s0 = inlined_call_operand.vmem [shape: f32[2,8,128], index: 0, kind: input, shape index: {}]   ;;  %s1483_s1 = inlined_call_operand.vmem [shape: f32[2,4,8,8], index: 1, kind: input, shape index: {}]   ;;  %s1484_s2 = inlined_call_operand.vmem [shape: bf16[128,128], index: 2, kind: input, shape index: {}]   ;;  %s1485_s3 = inlined_call_operand.vmem [shape: bf16[32,128], index: 3, kind: input, shape index: {}]   ;;  %s1486_s4 = inlined_call_operand.hbm [shape: f32[2,8,128], index: 4, kind: output, shape index: {}]  }
   0x1   :  { %11 = vsyncpa [#allocation3 + $0x1], 0  ;;  %s1254_s15 = smov 0   ;;  %s1256_s16 = smov 0  }
   0x2   :  { %s1258_s17 = smov 0   ;;  %s1260_s18 = smov 0  }
   0x3 LB: > { %s1275_s19 = sadd.s32 4294967295, %s1210_s18   ;;  %s931_s20 = sadd.s32 4294967294, %s1210_s18   ;;  %s1210_s18 = sphi %s1260_s18, %s1492_s18   ;;  %s1206_s17 = sphi %s1258_s17, %s1491_s17   ;;  %s1202_s16 = sphi %s1256_s16, %s1490_s16   ;;  %s1198_s15 = sphi %s1254_s15, %s1489_s15  }
   0x4   : > { %s1279_s21 = sadd.s32 1, %s1210_s18   ;;  %s118_s22 = sadd.s32 1, %s1206_s17 }
   0x5   : > { %s115_s23 = ssub.s32 %s1210_s18, %s1279_s21  ;;  %p128_p0 = scmp.ne.s32.totalorder %s1206_s17, %s1202_s16 }
   0x6   : > { %p116_p1 = scmp.eq.s32.totalorder %s115_s23, 0  ;;  %p129_p2 = scmp.eq.s32.totalorder %s1275_s19, 1 }
   0x7   : > { %p134_p3 = scmp.ne.s32.totalorder %s1202_s16, %s1198_s15  ;;  %p135_p4 = scmp.eq.s32.totalorder %s931_s20, 1 }
   0x8   : > { %s1290_s24 = scalar_select %p116_p1, %s1206_s17, %s118_s22  }
   0x9   : > { %p1292_p5 = por %p129_p2, %p128_p0  ;;  %p1296_p6 = por %p135_p4, %p134_p3 }
   0xa   : > { %p934_p7 = scmp.ge.s32.totalorder %s1210_s18, 1  ;;  %p174_p8 = scmp.lt.s32.totalorder %s1210_s18, 3 }
   0xc   : > { %p175_p9 = pnand %p934_p7, %p174_p8 }
   0xd   : > { %v1122_v0 = vld [vmem:[%s1484_s2] sm:$0xff] (!%p175_p9)   ;;  %v1212_v1 = vmov (!%p175_p9), 0.0   ;;  %v1123_v2 = vld [vmem:[%s1484_s2 + $0x8] sm:$0xff] (!%p175_p9)   ;;  %vm1213_vm0 = vmmov (!%p175_p9), 0   ;;  %v1124_v3 = vld [vmem:[%s1484_s2 + $0x10] sm:$0xff] (!%p175_p9)   ;;  %p204_p10 = scmp.lt.s32.totalorder (!%p175_p9), %s1275_s19, 1 }
   0xe   : > { %178 = sbr.rel (%p175_p9) target bundleno = 2025 (0x7e9), region = 36  ;;  %991 = vmatprep.subr.bf16.mxu0 (!%p175_p9), %v1212_v1  ;;  %1011 = vmatprep.subr.bf16.mxu1 (!%p175_p9), %v1212_v1  ;;  %v1125_v4 = vld [vmem:[%s1484_s2 + $0x18] sm:$0xff] (!%p175_p9)   ;;  %v1126_v5 = vld [vmem:[%s1484_s2 + $0x20] sm:$0xff] (!%p175_p9)   ;;  %v1127_v6 = vld [vmem:[%s1484_s2 + $0x28] sm:$0xff] (!%p175_p9)   ;;  %s1214_s5 = smov (!%p175_p9), 64   ;;  %vm328_vm1 = vcmask (!%p175_p9), 64512  }
   0xf   : > { %992 = vmatpush3.bf16.msra.mxu0 (!%p175_p9), %v1122_v0  ;;  %1007 = vmatprep.mubr.msk.bf16.mxu0 (!%p175_p9), %vm1213_vm0, %v1212_v1  ;;  %v1128_v7 = vld [vmem:[%s1484_s2 + $0x30] sm:$0xff] (!%p175_p9)   ;;  %v1129_v8 = vld [vmem:[%s1484_s2 + $0x38] sm:$0xff] (!%p175_p9)   ;;  %s1215_s6 = smov (!%p175_p9), 96   ;;  %s1216_s7 = smov (!%p175_p9), 88   ;;  %vm392_vm2 = vcmask (!%p175_p9), 1043456   ;;  %vm779_vm3 = vcmask (!%p175_p9), 130048  }
  0x10   : > { %993 = vmatprep.subr.bf16.mxu0 (!%p175_p9), %v1212_v1  ;;  %1013 = vmatprep.mubr.msk.bf16.mxu1 (!%p175_p9), %vm1213_vm0, %v1212_v1  ;;  %s1217_s13 = smov (!%p175_p9), 72   ;;  %s1220_s20 = smov (!%p175_p9), 112   ;;  %vm781_vm4 = vcmask (!%p175_p9), 195584   ;;  %vm800_vm5 = vcmask (!%p175_p9), 261120  }
  0x11   : > { %s1221_s22 = smov (!%p175_p9), 104   ;;  %s1222_s23 = smov (!%p175_p9), 56  }
  0x12   : > { %s1223_s27 = smov (!%p175_p9), 40   ;;  %s1227_s9 = smov (!%p175_p9), 24  }
  0x13   : > { %994 = vmatpush3.bf16.msra.mxu0 (!%p175_p9), %v1123_v2  ;;  %s201_s10 = sand.u32 (!%p175_p9), 1, %s1202_s16  }
  0x14   : > { %995 = vmatprep.subr.bf16.mxu0 (!%p175_p9), %v1212_v1 }
  0x15   : > { %s1329_s11 = scalar_select %p204_p10, %s1275_s19, 1 }
  0x17   : > { %996 = vmatpush3.bf16.msra.mxu0 %v1124_v3  ;;  %s936_s14 = sshll.u32 %s1329_s11, 3  ;;  %s962_s8 = sshll.u32 %s1329_s11, 5 }
  0x18   : > { %997 = vmatprep.subr.bf16.mxu0 %v1212_v1  ;;  %s207_s28 = scalar_lea.vmem %s1482_s0, %s936_s14  ;;  %s1371_s12 = scalar_lea.vmem %s1483_s1, %s962_s8 }
  0x19   : > { %v1346_v9 = vld [vmem:[%s207_s28] sm:$0xff]  ;;  %s1218_s11 = smov 120   ;;  %s1219_s14 = smov 80   ;;  %v322_v45 = vld [vmem:[%s1371_s12 + $0x10] sm:$0xff]  ;;  %v321_v56 = vld [vmem:[%s1371_s12 + $0x8] sm:$0xff] }
  0x1a   : > { %v215_v10 = vpack.c.bf16 %v1346_v9, %v1346_v9  ;;  %v320_v20 = vld [vmem:[%s1371_s12] sm:$0xff]  ;;  %v323_v58 = vld [vmem:[%s1371_s12 + $0x18] sm:$0xff]  ;;  %s1224_s28 = smov 48   ;;  %s1226_s8 = smov 16  }
  0x1b   : > { %998 = vmatpush3.bf16.msra.mxu0 %v1125_v4  ;;  %s935_s12 = sshll.u32 %s201_s10, 3 }
  0x1c   : > { %999 = vmatprep.subr.bf16.mxu0 %v1212_v1 }
  0x1f   : > { %1000 = vmatpush3.bf16.msra.mxu0 %v1126_v5 }
  0x20   : > { %1001 = vmatprep.subr.bf16.mxu0 %v1212_v1 }
  0x23   : > { %1002 = vmatpush3.bf16.msra.mxu0 %v1127_v6 }
  0x24   : > { %1003 = vmatprep.subr.bf16.mxu0 %v1212_v1 }
  0x27   : > { %1004 = vmatpush3.bf16.msra.mxu0 %v1128_v7 }
  0x28   : > { %1005 = vmatprep.subr.bf16.mxu0 %v1212_v1 }
  0x2b   : > { %1006 = vmatpush3.bf16.msra.mxu0 %v1129_v8 }
  0x2c   : > { %1035 = vmatprep.subr.bf16.mxu0 %v1212_v1 }
  0x2e   : > { %1008 = vmatmul.mubr.bf16.vlgmr.msra.gmra.mrb[0].mxu0 %v215_v10 }
  0x2f   : > { %1037 = vmatprep.mubr.msk.bf16.mxu0 %vm1213_vm0, %v1212_v1 }
 0x101   : > { %v314_v11 = vpop.f32.mrb[0].mxu0 }
 0x102   : > { %v1354_v12 = vpack.c.bf16 %v314_v11, %v314_v11  ;;  %v1009_v13 = vpop.f32.mrb[1].mxu0 }
 0x103   : > { %v317_v14 = vpop.f32.mrb[2].mxu0 }
 0x104   : > { %387 = vrot.lane.b32.xlu1 %v1354_v12, %s1214_s5  ;;  %326 = vrot.lane.b32.xlu0 %v1354_v12, %s1215_s6  ;;  %v1010_v15 = vpop.f32.mrb[3].mxu0 }
 0x108   : > { %438 = vrot.lane.b32.xlu1 %v1354_v12, %s1216_s7  ;;  %s1225_s7 = smov 8  }
 0x176   : > { %v327_v16 = vpop.permute.xlu0 %326  ;;  %v388_v18 = vpop.permute.xlu1 %387 }
 0x177   : > { %v333_v17 = vsel %vm328_vm1, %v327_v16, 0  ;;  %v394_v19 = vsel %vm392_vm2, %v388_v18, 0 }
 0x178   : > { %1012 = vmatpush3.bf16.xpose.msra.mxu1 %v333_v17 }
 0x179   : > { %1017 = vmatprep.subr.bf16.mxu1 %v1212_v1 }
 0x17a   : > { %v439_v32 = vpop.permute.xlu1 %438 }
 0x17b   : > { %v444_v41 = vsel %vm328_vm1, %v439_v32, 0 }
 0x17f   : > { %1014 = vmatmul.mubr.msk.bf16.vlgmr.msra.gmra.mrb[0].mxu1 %vm328_vm1, %v1354_v12 }
 0x180   : > { %1018 = vmatpush3.bf16.msra.mxu1 %v394_v19  ;;  %1019 = vmatprep.mubr.msk.bf16.mxu1 %vm1213_vm0, %v1212_v1 }
 0x181   : > { %1023 = vmatprep.subr.bf16.mxu1 %v1212_v1 }
 0x252   : > { %v369_v21 = vpop.f32.mrb[0].mxu1 }
 0x253   : > { %v370_v22 = vadd.f32 %v369_v21, %v320_v20  ;;  %v1015_v23 = vpop.f32.mrb[1].mxu1 }
 0x254   : > { %v372_v24 = vpop.f32.mrb[2].mxu1 }
 0x255   : > { %v1016_v25 = vpop.f32.mrb[3].mxu1  ;;  %v375_v26 = vsel %vm328_vm1, %v370_v22, -inf }
 0x256   : > { %376 = vmax.xlane.f32.xlu0 %v375_v26 }
 0x26c   : > { %658 = vrot.lane.b32.xlu0 %v1354_v12, %s1217_s13  ;;  %s959_s13 = sshll.u32 %s1275_s19, 7  ;;  %s847_s19 = scalar_lea.sflag [#allocation3], %s201_s10 }
 0x2e3   : > { %v377_v27 = vpop.xlane.xlu0 %376 }
 0x2e4   : > { %v378_v28 = vsub.f32 %v370_v22, %v377_v27 }
 0x2e6   : > { %v379_v29 = vmul.f32 1.442695, %v378_v28 }
 0x2e7   : > { %v659_v39 = vpop.permute.xlu0 %658 }
 0x2e8   : > { %1132 = vpow2.f32 %v379_v29  ;;  %v664_v43 = vsel %vm328_vm1, %v659_v39, 0 }
 0x2f2   : > { %v1133_v30 = vpop.eup %1132 }
 0x2f3   : > { %v381_v31 = vsel %vm328_vm1, %v1133_v30, 0.0 }
 0x2f4   : > { %382 = vadd.xlane.f32.xlu1 %v381_v31 }
 0x305   : > { %436 = vrot.lane.b32.xlu1 %v1354_v12, %s1218_s11  ;;  %s203_s11 = scalar_lea.vmem [#allocation2], %s935_s12 }
 0x309   : > { %548 = vrot.lane.b32.xlu1 %v1354_v12, %s1219_s14  ;;  %s860_s14 = sshll.u32 %s203_s11, 4  ;;  %s1442_s14 = int_to_ptr.vmem [resolvable:$true] %s860_s14 }
 0x30d   : > { %546 = vrot.lane.b32.xlu1 %v1354_v12, %s1220_s20 }
 0x311   : > { %656 = vrot.lane.b32.xlu1 %v1354_v12, %s1221_s22 }
 0x381   : > { %v383_v33 = vpop.xlane.xlu1 %382 }
 0x382   : > { %1134 = vrcp.f32 %v383_v33 }
 0x385   : > { %v437_v34 = vpop.permute.xlu1 %436 }
 0x389   : > { %v549_v35 = vpop.permute.xlu1 %548 }
 0x38a   : > { %v554_v36 = vsel %vm328_vm1, %v549_v35, 0 }
 0x38b   : > { %1036 = vmatpush3.bf16.xpose.msra.mxu0 %v554_v36 }
 0x38c   : > { %v1135_v37 = vpop.eup %1134  ;;  %1047 = vmatprep.subr.bf16.mxu0 %v1212_v1 }
 0x38d   : > { %v385_v38 = vmul.f32 %v1135_v37, %v1133_v30  ;;  %v547_v42 = vpop.permute.xlu1 %546 }
 0x38f   : > { %v386_v40 = vpack.c.bf16 %v385_v38, %v385_v38 }
 0x391   : > { %1020 = vmatmul.mubr.msk.bf16.vlgmr.msra.gmra.mrb[4].mxu1 %vm328_vm1, %v386_v40  ;;  %v657_v44 = vpop.permute.xlu1 %656 }
 0x392   : > { %1024 = vmatpush3.bf16.xpose.msra.mxu1 %v444_v41  ;;  %1038 = vmatmul.mubr.msk.bf16.vlgmr.msra.gmra.mrb[4].mxu0 %vm328_vm1, %v547_v42  ;;  %v1130_v41 = vld [vmem:[%s1485_s3] sm:$0xff]   ;;  %v1131_v42 = vld [vmem:[%s1485_s3 + $0x8] sm:$0xff]  }
 0x393   : > { %1048 = vmatpush3.bf16.xpose.msra.mxu0 %v664_v43  ;;  %1025 = vmatprep.mubr.msk.bf16.mxu1 %vm1213_vm0, %v1212_v1 }
 0x394   : > { %1049 = vmatprep.mubr.msk.bf16.mxu0 %vm1213_vm0, %v1212_v1  ;;  %1029 = vmatprep.subr.bf16.mxu1 %v1212_v1 }
 0x395   : > { %1059 = vmatprep.subr.bf16.mxu0 %v1212_v1 }
 0x399   : > { %1026 = vmatmul.mubr.msk.bf16.vlgmr.msra.gmra.mrb[8].mxu1 %vm328_vm1, %v437_v34 }
 0x39a   : > { %1050 = vmatmul.mubr.msk.bf16.vlgmr.msra.gmra.mrb[8].mxu0 %vm328_vm1, %v657_v44  ;;  %1031 = vmatprep.mubr.msk.bf16.mxu1 %vm1213_vm0, %v1212_v1 }
 0x39b   : > { %1063 = vmatprep.mubr.msk.bf16.mxu0 %vm1213_vm0, %v1212_v1  ;;  %1060 = vmatpush3.bf16.msra.mxu0 %v1130_v41 }
 0x39c   : > { %1061 = vmatprep.subr.bf16.mxu0 %v1212_v1 }
 0x39f   : > { %1062 = vmatpush3.bf16.msra.mxu0 %v1131_v42 }
 0x464   : > { %v1400_v46 = vpop.f32.mrb[4].mxu1 }
 0x465   : > { %v1021_v47 = vpop.f32.mrb[5].mxu1  ;;  %v590_v48 = vpop.f32.mrb[4].mxu0 }
 0x466   : > { %v591_v49 = vadd.f32 %v590_v48, %v322_v45  ;;  %v433_v50 = vpop.f32.mrb[6].mxu1  ;;  %v1039_v51 = vpop.f32.mrb[5].mxu0 }
 0x467   : > { %v1022_v52 = vpop.f32.mrb[7].mxu1  ;;  %v593_v53 = vpop.f32.mrb[6].mxu0 }
 0x468   : > { %v1040_v54 = vpop.f32.mrb[7].mxu0  ;;  %v596_v55 = vsel %vm328_vm1, %v591_v49, -inf }
 0x469   : > { %597 = vmax.xlane.f32.xlu0 %v596_v55 }
 0x46c   : > { %v480_v57 = vpop.f32.mrb[8].mxu1 }
 0x46d   : > { %v481_v59 = vadd.f32 %v480_v57, %v321_v56  ;;  %v1027_v60 = vpop.f32.mrb[9].mxu1  ;;  %v700_v61 = vpop.f32.mrb[8].mxu0 }
 0x46e   : > { %v483_v62 = vpop.f32.mrb[10].mxu1  ;;  %v1051_v63 = vpop.f32.mrb[9].mxu0  ;;  %v701_v0 = vadd.f32 %v700_v61, %v323_v58 }
 0x46f   : > { %v1028_v2 = vpop.f32.mrb[11].mxu1  ;;  %v703_v3 = vpop.f32.mrb[10].mxu0  ;;  %v486_v4 = vsel %vm328_vm1, %v481_v59, -inf }
 0x470   : > { %487 = vmax.xlane.f32.xlu1 %v486_v4  ;;  %v1052_v5 = vpop.f32.mrb[11].mxu0  ;;  %v706_v6 = vsel %vm328_vm1, %v701_v0, -inf }
 0x474   : > { %707 = vmax.xlane.f32.xlu1 %v706_v6 }
 0x4f6   : > { %v598_v7 = vpop.xlane.xlu0 %597 }
 0x4f7   : > { %v599_v8 = vsub.f32 %v591_v49, %v598_v7 }
 0x4f9   : > { %v600_v10 = vmul.f32 1.442695, %v599_v8 }
 0x4fb   : > { %1136 = vpow2.f32 %v600_v10 }
 0x4fd   : > { %v488_v11 = vpop.xlane.xlu1 %487 }
 0x4fe   : > { %v489_v13 = vsub.f32 %v481_v59, %v488_v11 }
 0x500   : > { %v490_v14 = vmul.f32 1.442695, %v489_v13 }
 0x501   : > { %v708_v15 = vpop.xlane.xlu1 %707 }
 0x502   : > { %1138 = vpow2.f32 %v490_v14  ;;  %v709_v16 = vsub.f32 %v701_v0, %v708_v15 }
 0x504   : > { %v710_v17 = vmul.f32 1.442695, %v709_v16 }
 0x505   : > { %v1137_v18 = vpop.eup %1136 }
 0x506   : > { %1140 = vpow2.f32 %v710_v17  ;;  %v602_v19 = vsel %vm328_vm1, %v1137_v18, 0.0 }
 0x507   : > { %603 = vadd.xlane.f32.xlu1 %v602_v19 }
 0x50c   : > { %v1139_v20 = vpop.eup %1138 }
 0x50d   : > { %v492_v21 = vsel %vm328_vm1, %v1139_v20, 0.0 }
 0x50e   : > { %493 = vadd.xlane.f32.xlu1 %v492_v21 }
 0x510   : > { %v1141_v22 = vpop.eup %1140 }
 0x511   : > { %v712_v23 = vsel %vm328_vm1, %v1141_v22, 0.0 }
 0x512   : > { %713 = vadd.xlane.f32.xlu0 %v712_v23 }
 0x51f   : > { %498 = vrot.lane.b32.xlu1 %v1354_v12, %s1222_s23  ;;  %s1440_s23 = scalar_lea.hbm %s1486_s4, %s959_s13 }
 0x523   : > { %718 = vrot.lane.b32.xlu1 %v1354_v12, %s1223_s27  ;;  %s1148_s27 = scalar_lea.vmem %s1442_s14, 128 }
 0x524   : > { %p1149_p11 = scmp.ne.s32.totalorder %s1442_s14, %s1148_s27 }
 0x526   : > { %p1150_p12 = pnand %p1149_p11, %p1292_p5 }
 0x528   : > { %608 = vrot.lane.b32.xlu0 %v1354_v12, %s1224_s28  ;;  %p1151_p13 = pneg %p1150_p12  ;;  %s1228_s28 = smov [#allocation2]  }
 0x529   : > { %s1152_s29 = sshll.u32 %s1228_s28, 4  ;;  %s1153_s29 = int_to_ptr.vmem [resolvable:$false] %s1152_s29 }
 0x52a   : > { %s1154_s30 = scalar_lea.vmem %s1153_s29, 256  ;;  %p1155_p0 = scmp.lt.s32.totalorder %s1442_s14, %s1153_s29 }
 0x52b   : > { %p1156_p1 = scmp.lt.s32.totalorder %s1154_s30, %s1148_s27 }
 0x52d   : > { %p1157_p2 = por %p1156_p1, %p1155_p0 }
 0x52f   : > { %p1158_p3 = pnand %p1157_p2, %p1151_p13 }
 0x594   : > { %v604_v24 = vpop.xlane.xlu1 %603 }
 0x59b   : > { %v494_v25 = vpop.xlane.xlu1 %493 }
 0x59c   : > { %1142 = vrcp.f32 %v494_v25 }
 0x59d   : > { %1144 = vrcp.f32 %v604_v24 }
 0x59f   : > { %v499_v26 = vpop.permute.xlu1 %498  ;;  %v714_v28 = vpop.xlane.xlu0 %713 }
 0x5a0   : > { %v504_v27 = vsel %vm392_vm2, %v499_v26, 0  ;;  %1146 = vrcp.f32 %v714_v28 }
 0x5a1   : > { %1030 = vmatpush3.bf16.msra.mxu1 %v504_v27 }
 0x5a2   : > { %1041 = vmatprep.subr.bf16.mxu1 %v1212_v1 }
 0x5a3   : > { %v609_v31 = vpop.permute.xlu0 %608  ;;  %v719_v35 = vpop.permute.xlu1 %718 }
 0x5a4   : > { %v614_v34 = vsel %vm392_vm2, %v609_v31, 0  ;;  %v724_v38 = vsel %vm392_vm2, %v719_v35, 0 }
 0x5a6   : > { %v1143_v29 = vpop.eup %1142 }
 0x5a7   : > { %v496_v30 = vmul.f32 %v1143_v29, %v1139_v20  ;;  %v1145_v33 = vpop.eup %1144 }
 0x5a8   : > { %v606_v12 = vmul.f32 %v1145_v33, %v1137_v18 }
 0x5a9   : > { %v497_v32 = vpack.c.bf16 %v496_v30, %v496_v30 }
 0x5aa   : > { %v607_v36 = vpack.c.bf16 %v606_v12, %v606_v12  ;;  %v1147_v37 = vpop.eup %1146 }
 0x5ab   : > { %1032 = vmatmul.mubr.msk.bf16.vlgmr.msra.gmra.mrb[12].mxu1 %vm328_vm1, %v497_v32  ;;  %v716_v39 = vmul.f32 %v1147_v37, %v1141_v22 }
 0x5ac   : > { %1042 = vmatpush3.bf16.msra.mxu1 %v614_v34  ;;  %1043 = vmatprep.mubr.msk.bf16.mxu1 %vm1213_vm0, %v1212_v1 }
 0x5ad   : > { %1053 = vmatprep.subr.bf16.mxu1 %v1212_v1  ;;  %v717_v40 = vpack.c.bf16 %v716_v39, %v716_v39 }
 0x5b3   : > { %1044 = vmatmul.mubr.msk.bf16.vlgmr.msra.gmra.mrb[16].mxu1 %vm328_vm1, %v607_v36 }
 0x5b4   : > { %1054 = vmatpush3.bf16.msra.mxu1 %v724_v38  ;;  %1055 = vmatprep.mubr.msk.bf16.mxu1 %vm1213_vm0, %v1212_v1 }
 0x5bb   : > { %1056 = vmatmul.mubr.msk.bf16.vlgmr.msra.gmra.mrb[20].mxu1 %vm328_vm1, %v717_v40 }
 0x67e   : > { %v540_v43 = vpop.f32.mrb[12].mxu1 }
 0x67f   : > { %767 = vrot.lane.b32.xlu1 %v540_v43, %s1225_s7  ;;  %v1033_v44 = vpop.f32.mrb[13].mxu1 }
 0x680   : > { %v543_v45 = vpop.f32.mrb[14].mxu1 }
 0x681   : > { %v1034_v47 = vpop.f32.mrb[15].mxu1 }
 0x686   : > { %v650_v48 = vpop.f32.mrb[16].mxu1 }
 0x687   : > { %771 = vrot.lane.b32.xlu0 %v650_v48, %s1226_s8  ;;  %v1045_v49 = vpop.f32.mrb[17].mxu1 }
 0x688   : > { %v653_v50 = vpop.f32.mrb[18].mxu1 }
 0x689   : > { %v1046_v51 = vpop.f32.mrb[19].mxu1 }
 0x68e   : > { %v760_v52 = vpop.f32.mrb[20].mxu1 }
 0x68f   : > { %775 = vrot.lane.b32.xlu1 %v760_v52, %s1227_s9  ;;  %v1057_v53 = vpop.f32.mrb[21].mxu1 }
 0x690   : > { %v763_v1 = vpop.f32.mrb[22].mxu1 }
 0x691   : > { %v1058_v54 = vpop.f32.mrb[23].mxu1 }
 0x6f1   : > { %v768_v55 = vpop.permute.xlu1 %767 }
 0x6f2   : > { %v778_v57 = vsel %vm328_vm1, %v1400_v46, %v768_v55 }
 0x6f9   : > { %v772_v56 = vpop.permute.xlu0 %771 }
 0x6fa   : > { %v780_v58 = vsel %vm779_vm3, %v778_v57, %v772_v56 }
 0x701   : > { %v776_v59 = vpop.permute.xlu1 %775 }
 0x702   : > { %v782_v60 = vsel %vm781_vm4, %v780_v58, %v776_v59 }
 0x703   : > { %v783_v61 = vpack.c.bf16 %v782_v60, %v782_v60 }
 0x705   : > { %1064 = vmatmul.mubr.msk.bf16.vlgmr.msra.gmra.mrb[12].mxu0 %vm800_vm5, %v783_v61 }
 0x7d8   : > { %v838_v62 = vpop.f32.mrb[12].mxu0 }
 0x7d9   : > { %v844_v63 = vadd.f32 %v838_v62, %v1346_v9  ;;  %v1065_v0 = vpop.f32.mrb[13].mxu0 }
 0x7da   : > { %v841_v46 = vpop.f32.mrb[14].mxu0 }
 0x7db   : > { %845 = vst [vmem:[%s203_s11] sm:$0xff] %v844_v63  ;;  %v1066_v2 = vpop.f32.mrb[15].mxu0 }
 0x7dc   : > { %1161 = shalt.err (!%p1158_p3)
}
 0x7dd   : > { %s1162_s5 = scalar_lea.hbm %s1440_s23, 128  ;;  %s1166_s8 = scalar_lea.hbm %s1486_s4, 256 }
 0x7de   : > { %p1163_p4 = scmp.ne.s32.totalorder %s1440_s23, %s1162_s5  ;;  %p1167_p9 = scmp.lt.u32.totalorder %s1440_s23, %s1486_s4 }
 0x7df   : > { %p1168_p10 = scmp.lt.u32.totalorder %s1166_s8, %s1162_s5  ;;  %p1170_p12 = scmp.lt.u32.totalorder %s1162_s5, %s1440_s23 }
 0x7e0   : > { %p1164_p7 = pnand %p1163_p4, %p1292_p5 }
 0x7e1   : > { %p1169_p11 = por %p1168_p10, %p1167_p9 }
 0x7e2   : > { %p1165_p8 = pneg %p1164_p7 }
 0x7e3   : > { %p1171_p13 = por %p1170_p12, %p1169_p11 }
 0x7e5   : > { %p1172_p0 = pnand %p1171_p13, %p1165_p8 }
 0x7e7   : > { %1175 = shalt.err (!%p1172_p0)
}
 0x7e8   : > { %1067 = dma.vmem_to_hbm [thread:$0]  (%p1292_p5), %s1442_s14, 128, %s1440_s23, %s847_s19  }
 0x7e9 PF: > { %p1073_p1 = scmp.ge.s32.totalorder %s1210_s18, 2  ;;  %s872_s12 = sand.u32 1, %s1198_s15  }
 0x7ea   : > { %s873_s13 = scalar_lea.sflag [#allocation3], %s872_s12 }
 0x7eb   : > { %p1070_p2 = pnand %p1073_p1, %p1296_p6 }
 0x7ed   : > { %1193 = dma.done.wait (!%p1070_p2), %s873_s13, 128  }
 0x7ee   : > { %1195 = vsyncadd (!%p1070_p2), %s873_s13, 4294967168  ;;  %p14_p3 = scmp.ge.s32.totalorder %s1279_s21, 4   ;;  %s1489_s15 = smov %s1202_s16 }
 0x7ef   : > { %s1490_s16 = smov %s1206_s17  ;;  %s1491_s17 = smov %s1290_s24 }
 0x7f0   : > { %s1492_s18 = smov %s1279_s21  ;;  %16 = sbr.rel (!%p14_p3) target bundleno = 3 (0x3), region = 74 }
 0x7f7   :  { %878 = vsyncpa [#allocation3], 1 }
 0x7f8   :  { %880 = vsyncpa [#allocation3 + $0x1], 1 }

</bundles_post_ra>
